<compile_context>
chip_gen: v7x
topology: tpu7x:2x2x1
jax: 0.10.0
libtpu: 0.0.40
codegen_flags: <defaults>
</compile_context>

<pallas_src>
import functools

import jax
import jax.numpy as jnp
from jax.experimental import pallas as pl
from jax.experimental.pallas import tpu as pltpu


LANE = 128          # lane width: last-dim alignment
ROW_ALIGN = 16      # bf16 sublane minimum for the row (M) tile


def _round_up(x, m):
    return (x + m - 1) // m * m


def _ffn_kernel(x_ref, w1_ref, b1_ref, w2_ref, b2_ref, o_ref, acc_ref):
    k = pl.program_id(1)

    @pl.when(k == 0)
    def _init():
        # Start the fp32 accumulator from b2 so the second bias is added exactly once.
        acc_ref[...] = jnp.broadcast_to(
            b2_ref[...].astype(jnp.float32), acc_ref.shape)

    # Partial hidden activations for this d_ff chunk (fp32 MXU accumulation).
    h = jnp.dot(x_ref[...], w1_ref[...], preferred_element_type=jnp.float32)
    h = jnp.maximum(h + b1_ref[...], 0.0)          # bias + ReLU in fp32 vregs
    # dropout (eval mode) == identity
    acc_ref[...] += jnp.dot(h.astype(w2_ref.dtype), w2_ref[...],
                            preferred_element_type=jnp.float32)

    @pl.when(k == pl.num_programs(1) - 1)
    def _finalize():
        o_ref[...] = acc_ref[...].astype(o_ref.dtype)


@functools.partial(jax.jit, static_argnames=("tile_n", "tile_ff"))
def _feed_forward_padded(x2, w1, b1, w2, b2, tile_n, tile_ff):
    n_pad, dm_pad = x2.shape
    dff_pad = w1.shape[1]
    grid = (n_pad // tile_n, dff_pad // tile_ff)

    # Advisory cost: two matmuls; weights re-streamed once per row tile.
    flops = 4 * n_pad * dm_pad * dff_pad
    bytes_accessed = (3 * n_pad * dm_pad) * 2 \
        + grid[0] * (w1.size + w2.size) * 2 \
        + (b1.size + b2.size) * 4

    return pl.pallas_call(
        _ffn_kernel,
        out_shape=jax.ShapeDtypeStruct((n_pad, dm_pad), jnp.float32),
        grid_spec=pltpu.PrefetchScalarGridSpec(
            num_scalar_prefetch=0,
            grid=grid,
            in_specs=[
                pl.BlockSpec((tile_n, dm_pad), lambda i, k: (i, 0)),    # x rows
                pl.BlockSpec((dm_pad, tile_ff), lambda i, k: (0, k)),   # W1 chunk
                pl.BlockSpec((1, tile_ff), lambda i, k: (0, k)),        # b1 chunk
                pl.BlockSpec((tile_ff, dm_pad), lambda i, k: (k, 0)),   # W2 chunk
                pl.BlockSpec((1, dm_pad), lambda i, k: (0, 0)),         # b2
            ],
            out_specs=pl.BlockSpec((tile_n, dm_pad), lambda i, k: (i, 0)),
            scratch_shapes=[pltpu.VMEM((tile_n, dm_pad), jnp.float32)],
        ),
        compiler_params=pltpu.CompilerParams(
            dimension_semantics=("parallel", "arbitrary"),
            vmem_limit_bytes=48 * 1024 * 1024,
        ),
        cost_estimate=pl.CostEstimate(
            flops=int(flops), transcendentals=0,
            bytes_accessed=int(bytes_accessed)),
    )(x2, w1, b1, w2, b2)


def feed_forward(x, w1, b1, w2, b2, *, tile_n=256, tile_ff=512):
    """FeedForward(x) = ReLU(x @ W1 + b1) @ W2 + b2   (eval-mode dropout = identity).

    x: (..., d_model); W1: (d_model, d_ff); W2: (d_ff, d_model).
    """
    orig_shape = x.shape
    orig_dtype = x.dtype
    d_model = x.shape[-1]
    d_ff = w1.shape[-1]

    x2 = x.reshape(-1, d_model)
    n = x2.shape[0]

    # Tile / padding geometry.
    tile_n = max(ROW_ALIGN, _round_up(tile_n, ROW_ALIGN))
    tile_n = min(tile_n, _round_up(n, ROW_ALIGN))      # don't over-tile tiny inputs
    n_pad = _round_up(n, tile_n)

    dm_pad = _round_up(d_model, LANE)
    dff_pad = _round_up(d_ff, LANE)
    tile_ff = max(LANE, _round_up(tile_ff, LANE))
    tile_ff = min(tile_ff, dff_pad)
    dff_pad = _round_up(dff_pad, tile_ff)

    # Zero padding is inert: zero W1 rows / W2 columns / bias entries contribute 0,
    # and padded output rows/cols are sliced off below.
    x2p = jnp.pad(x2, ((0, n_pad - n), (0, dm_pad - d_model)))
    w1p = jnp.pad(w1, ((0, dm_pad - d_model), (0, dff_pad - d_ff)))
    b1p = jnp.pad(b1, (0, dff_pad - d_ff)).reshape(1, dff_pad)
    w2p = jnp.pad(w2, ((0, dff_pad - d_ff), (0, dm_pad - d_model)))
    b2p = jnp.pad(b2, (0, dm_pad - d_model)).reshape(1, dm_pad)

    # bf16 on the MXU for activations/weights; biases + accumulation stay fp32.
    x2p = x2p.astype(jnp.bfloat16)
    w1p = w1p.astype(jnp.bfloat16)
    w2p = w2p.astype(jnp.bfloat16)
    b1p = b1p.astype(jnp.float32)
    b2p = b2p.astype(jnp.float32)

    out = _feed_forward_padded(x2p, w1p, b1p, w2p, b2p, tile_n, tile_ff)
    return out[:n, :d_model].reshape(orig_shape).astype(orig_dtype)


def init_params(key, d_model, d_ff, dtype=jnp.float32):
    """torch.nn.Linear-style init: U(-1/sqrt(fan_in), 1/sqrt(fan_in))."""
    k1, k2, k3, k4 = jax.random.split(key, 4)
    bound1 = 1.0 / (d_model ** 0.5)
    bound2 = 1.0 / (d_ff ** 0.5)
    w1 = jax.random.uniform(k1, (d_model, d_ff), dtype, -bound1, bound1)
    b1 = jax.random.uniform(k2, (d_ff,), dtype, -bound1, bound1)
    w2 = jax.random.uniform(k3, (d_ff, d_model), dtype, -bound2, bound2)
    b2 = jax.random.uniform(k4, (d_model,), dtype, -bound2, bound2)
    return w1, b1, w2, b2


def _ref_bf16(x, w1, b1, w2, b2):
    """Reference matching the kernel's bf16-input / fp32-accumulate arithmetic."""
    xb = x.reshape(-1, x.shape[-1]).astype(jnp.bfloat16)
    w1b = w1.astype(jnp.bfloat16)
    w2b = w2.astype(jnp.bfloat16)
    h = jnp.maximum(
        jnp.dot(xb, w1b, preferred_element_type=jnp.float32) + b1, 0.0)
    y = jnp.dot(h.astype(jnp.bfloat16), w2b,
                preferred_element_type=jnp.float32) + b2
    return y.reshape(x.shape)


if __name__ == "__main__":
    key = jax.random.PRNGKey(0)
    kx, kp, kx2, kp2 = jax.random.split(key, 4)

    # --- small shapes (module-consistent toy case) ---
    batch, seq, d_model, d_ff = 2, 8, 32, 64
    x = jax.random.normal(kx, (batch, seq, d_model), jnp.float32)
    w1, b1, w2, b2 = init_params(kp, d_model, d_ff)

    y = feed_forward(x, w1, b1, w2, b2)
    y = jax.block_until_ready(y)
    assert y.shape == x.shape

    # fp32 reference (kernel uses bf16 matmuls with fp32 accumulation -> loose tol)
    y_fp32 = jnp.maximum(x @ w1 + b1, 0.0) @ w2 + b2
    assert jnp.allclose(y, y_fp32, atol=2e-2, rtol=2e-2)
    # bf16-emulated reference (tight tol)
    assert jnp.allclose(y, _ref_bf16(x, w1, b1, w2, b2), atol=1e-3, rtol=1e-3)

    # --- larger shapes: exercise multiple row tiles, multiple d_ff chunks, padding ---
    batch2, seq2, dm2, dff2 = 3, 100, 256, 640
    x_big = jax.random.normal(kx2, (batch2, seq2, dm2), jnp.float32)
    w1b_, b1b_, w2b_, b2b_ = init_params(kp2, dm2, dff2)

    y_big = feed_forward(x_big, w1b_, b1b_, w2b_, b2b_, tile_n=256, tile_ff=256)
    y_big = jax.block_until_ready(y_big)
    assert y_big.shape == x_big.shape
    assert jnp.allclose(y_big, _ref_bf16(x_big, w1b_, b1b_, w2b_, b2b_),
                        atol=1e-3, rtol=1e-3)

    print("KERNEL_OK")
</pallas_src>

<mosaic_0001>
module attributes {stable_mosaic.version = 11 : i64} {
  func.func @_ffn_kernel(%arg0: i32, %arg1: i32, %arg2: memref<16x128xbf16, #tpu.memory_space<vmem>>, %arg3: memref<128x128xbf16, #tpu.memory_space<vmem>>, %arg4: memref<1x128xf32, #tpu.memory_space<vmem>>, %arg5: memref<128x128xbf16, #tpu.memory_space<vmem>>, %arg6: memref<1x128xf32, #tpu.memory_space<vmem>>, %arg7: memref<16x128xf32, #tpu.memory_space<vmem>>, %arg8: memref<16x128xf32, #tpu.memory_space<vmem>>) attributes {dimension_semantics = [#tpu.dimension_semantics<parallel>, #tpu.dimension_semantics<arbitrary>], iteration_bounds = array<i64: 1, 1>, scalar_prefetch = 0 : i64, scratch_operands = 1 : i64, tpu.core_type = #tpu.core_type<tc>, window_params = [{transform_indices = @transform_0, window_bounds = array<i64: 16, 128>}, {transform_indices = @transform_1, window_bounds = array<i64: 128, 128>}, {transform_indices = @transform_2, window_bounds = array<i64: 1, 128>}, {transform_indices = @transform_3, window_bounds = array<i64: 128, 128>}, {pipeline_mode = #tpu.pipeline_mode<synchronous>, transform_indices = @transform_4, window_bounds = array<i64: 1, 128>}, {transform_indices = @transform_5, window_bounds = array<i64: 16, 128>}]} {
    %c0_i32 = arith.constant 0 : i32
    %0 = arith.cmpi eq, %arg1, %c0_i32 : i32
    %1 = arith.extui %0 : i1 to i32
    %c0_i32_0 = arith.constant 0 : i32
    %2 = arith.cmpi ne, %1, %c0_i32_0 : i32
    scf.if %2 {
      %c0_16 = arith.constant 0 : index
      %c0_17 = arith.constant 0 : index
      %20 = vector.load %arg6[%c0_16, %c0_17] : memref<1x128xf32, #tpu.memory_space<vmem>>, vector<1x128xf32>
      %21 = vector.shape_cast %20 : vector<1x128xf32> to vector<1x128xf32>
      %22 = vector.broadcast %21 : vector<1x128xf32> to vector<16x128xf32>
      %c0_18 = arith.constant 0 : index
      %c0_19 = arith.constant 0 : index
      %23 = vector.load %arg8[%c0_18, %c0_19] : memref<16x128xf32, #tpu.memory_space<vmem>>, vector<16x128xf32>
      tpu.vector_store %arg8[%c0_18, %c0_19], %22 {strides = array<i32>} : memref<16x128xf32, #tpu.memory_space<vmem>>, vector<16x128xf32>,
    } else {
    }
    %c0 = arith.constant 0 : index
    %c0_1 = arith.constant 0 : index
    %3 = vector.load %arg2[%c0, %c0_1] : memref<16x128xbf16, #tpu.memory_space<vmem>>, vector<16x128xbf16>
    %c0_2 = arith.constant 0 : index
    %c0_3 = arith.constant 0 : index
    %4 = vector.load %arg3[%c0_2, %c0_3] : memref<128x128xbf16, #tpu.memory_space<vmem>>, vector<128x128xbf16>
    %cst = arith.constant dense<0.000000e+00> : vector<16x128xf32>
    %5 = tpu.matmul %3, %4, %cst {dimension_numbers = #tpu.dot_dimension_numbers<[1], [0], [0], [1], [0, 0, 1, 1], [], []>} : vector<16x128xbf16>, vector<128x128xbf16>, vector<16x128xf32> -> vector<16x128xf32>
    %c0_4 = arith.constant 0 : index
    %c0_5 = arith.constant 0 : index
    %6 = vector.load %arg4[%c0_4, %c0_5] : memref<1x128xf32, #tpu.memory_space<vmem>>, vector<1x128xf32>
    %7 = vector.broadcast %6 : vector<1x128xf32> to vector<16x128xf32>
    %8 = arith.addf %5, %7 : vector<16x128xf32>
    %cst_6 = arith.constant 0.000000e+00 : f32
    %9 = vector.broadcast %cst_6 : f32 to vector<16x128xf32>
    %10 = arith.maximumf %8, %9 : vector<16x128xf32>
    %c0_7 = arith.constant 0 : index
    %c0_8 = arith.constant 0 : index
    %11 = vector.load %arg8[%c0_7, %c0_8] : memref<16x128xf32, #tpu.memory_space<vmem>>, vector<16x128xf32>
    %12 = arith.truncf %10 : vector<16x128xf32> to vector<16x128xbf16>
    %c0_9 = arith.constant 0 : index
    %c0_10 = arith.constant 0 : index
    %13 = vector.load %arg5[%c0_9, %c0_10] : memref<128x128xbf16, #tpu.memory_space<vmem>>, vector<128x128xbf16>
    %cst_11 = arith.constant dense<0.000000e+00> : vector<16x128xf32>
    %14 = tpu.matmul %12, %13, %cst_11 {dimension_numbers = #tpu.dot_dimension_numbers<[1], [0], [0], [1], [0, 0, 1, 1], [], []>} : vector<16x128xbf16>, vector<128x128xbf16>, vector<16x128xf32> -> vector<16x128xf32>
    %15 = arith.addf %11, %14 : vector<16x128xf32>
    %c0_12 = arith.constant 0 : index
    %c0_13 = arith.constant 0 : index
    %16 = vector.load %arg8[%c0_12, %c0_13] : memref<16x128xf32, #tpu.memory_space<vmem>>, vector<16x128xf32>
    tpu.vector_store %arg8[%c0_12, %c0_13], %15 {strides = array<i32>} : memref<16x128xf32, #tpu.memory_space<vmem>>, vector<16x128xf32>,
    %c0_i32_14 = arith.constant 0 : i32
    %17 = arith.cmpi eq, %arg1, %c0_i32_14 : i32
    %18 = arith.extui %17 : i1 to i32
    %c0_i32_15 = arith.constant 0 : i32
    %19 = arith.cmpi ne, %18, %c0_i32_15 : i32
    scf.if %19 {
      %c0_16 = arith.constant 0 : index
      %c0_17 = arith.constant 0 : index
      %20 = vector.load %arg8[%c0_16, %c0_17] : memref<16x128xf32, #tpu.memory_space<vmem>>, vector<16x128xf32>
      %c0_18 = arith.constant 0 : index
      %c0_19 = arith.constant 0 : index
      %21 = vector.load %arg7[%c0_18, %c0_19] : memref<16x128xf32, #tpu.memory_space<vmem>>, vector<16x128xf32>
      tpu.vector_store %arg7[%c0_18, %c0_19], %20 {strides = array<i32>} : memref<16x128xf32, #tpu.memory_space<vmem>>, vector<16x128xf32>,
    } else {
    }
    return
  }
  func.func @transform_0(%arg0: i32, %arg1: i32) -> (i32, i32) {
    %c0_i32 = arith.constant 0 : i32
    %c0_i32_0 = arith.constant 0 : i32
    return %arg0, %c0_i32 : i32, i32
  }
  func.func @transform_1(%arg0: i32, %arg1: i32) -> (i32, i32) {
    %c0_i32 = arith.constant 0 : i32
    %c0_i32_0 = arith.constant 0 : i32
    return %c0_i32, %arg1 : i32, i32
  }
  func.func @transform_2(%arg0: i32, %arg1: i32) -> (i32, i32) {
    %c0_i32 = arith.constant 0 : i32
    %c0_i32_0 = arith.constant 0 : i32
    return %c0_i32, %arg1 : i32, i32
  }
  func.func @transform_3(%arg0: i32, %arg1: i32) -> (i32, i32) {
    %c0_i32 = arith.constant 0 : i32
    %c0_i32_0 = arith.constant 0 : i32
    return %arg1, %c0_i32 : i32, i32
  }
  func.func @transform_4(%arg0: i32, %arg1: i32) -> (i32, i32) {
    %c0_i32 = arith.constant 0 : i32
    %c0_i32_0 = arith.constant 0 : i32
    %c0_i32_1 = arith.constant 0 : i32
    return %c0_i32, %c0_i32_0 : i32, i32
  }
  func.func @transform_5(%arg0: i32, %arg1: i32) -> (i32, i32) {
    %c0_i32 = arith.constant 0 : i32
    %c0_i32_0 = arith.constant 0 : i32
    return %arg0, %c0_i32 : i32, i32
  }
}

</mosaic_0001>

<bundles_post_ra>
// kernel: _feed_forward_padded.1
= control target key start
LH: loop header
LB: loop body
LE: loop exit
PB: predicated region body
PF: predicated region fallthrough
CT: control target
= control target key end

     0   :  { %10 = vsyncpa [#allocation4], 0  ;;  %s643_s0 = inlined_call_operand.hbm [shape: bf16[16,128], index: 0, kind: input, shape index: {}]   ;;  %s644_s1 = inlined_call_operand.hbm [shape: bf16[128,128], index: 1, kind: input, shape index: {}]   ;;  %s645_s2 = inlined_call_operand.vmem [shape: f32[1,128], index: 2, kind: input, shape index: {}]   ;;  %s646_s3 = inlined_call_operand.hbm [shape: bf16[128,128], index: 3, kind: input, shape index: {}]   ;;  %s647_s4 = inlined_call_operand.vmem [shape: f32[1,128], index: 4, kind: input, shape index: {}]   ;;  %s648_s5 = inlined_call_operand.hbm [shape: f32[16,128], index: 5, kind: output, shape index: {}]  }
   0x1   :  { %11 = vsyncpa [#allocation7], 0 }
   0x2   :  { %12 = vsyncpa [#allocation5], 0  ;;  %s533_s18 = smov [#allocation6]   ;;  %s534_s20 = smov [#allocation3]  }
   0x3   :  { %s30_s19 = sshll.u32 %s533_s18, 4  ;;  %s18_s21 = sshll.u32 %s534_s20, 4  ;;  %s31_s19 = int_to_ptr.vmem [resolvable:$true] %s30_s19  ;;  %s573_s21 = int_to_ptr.vmem [resolvable:$true] %s18_s21 }
   0x4   :  { %s439_s24 = scalar_lea.hbm %s644_s1, 1024 }
   0x5   :  { %p440_p0 = scmp.ne.s32.totalorder %s644_s1, %s439_s24  ;;  %p443_p1 = scmp.lt.u32.totalorder %s439_s24, %s644_s1 }
   0x7   :  { %p445_p2 = pnand %p443_p1, %p440_p0 }
   0x9   :  { %448 = shalt.err (!%p445_p2)
}
   0xa   :  { %s449_s29 = scalar_lea.vmem %s31_s19, 1024  ;;  %p454_p4 = scmp.lt.s32.totalorder %s31_s19, %s31_s19 }
   0xb   :  { %p450_p3 = scmp.ne.s32.totalorder %s31_s19, %s449_s29  ;;  %p455_p5 = scmp.lt.s32.totalorder %s449_s29, %s449_s29 }
   0xd   :  { %p456_p6 = por %p455_p5, %p454_p4 }
   0xf   :  { %p457_p7 = pnand %p456_p6, %p450_p3 }
  0x11   :  { %460 = shalt.err (!%p457_p7)
}
  0x12   :  { %s535_s30 = smov 64   ;;  %s536_s6 = smov 4  }
  0x13   :  { %36 = dma.hbm_to_vmem [thread:$0]  %s644_s1, 1024, %s31_s19, [#allocation7], %s535_s30, %s535_s30, %s536_s6  }
  0x14   :  { %s461_s11 = scalar_lea.hbm %s643_s0, 128 }
  0x15   :  { %p462_p8 = scmp.ne.s32.totalorder %s643_s0, %s461_s11  ;;  %p465_p9 = scmp.lt.u32.totalorder %s461_s11, %s643_s0 }
  0x17   :  { %p467_p10 = pnand %p465_p9, %p462_p8 }
  0x19   :  { %470 = shalt.err (!%p467_p10)
}
  0x1a   :  { %s471_s16 = scalar_lea.vmem %s573_s21, 128  ;;  %p476_p12 = scmp.lt.s32.totalorder %s573_s21, %s573_s21 }
  0x1b   :  { %p472_p11 = scmp.ne.s32.totalorder %s573_s21, %s471_s16  ;;  %p477_p13 = scmp.lt.s32.totalorder %s471_s16, %s471_s16 }
  0x1d   :  { %p478_p0 = por %p477_p13, %p476_p12 }
  0x1f   :  { %p479_p1 = pnand %p478_p0, %p472_p11 }
  0x21   :  { %482 = shalt.err (!%p479_p1)
}
  0x22   :  { %24 = dma.hbm_to_vmem [thread:$0]  %s643_s0, 128, %s573_s21, [#allocation4], %s535_s30, %s535_s30, %s536_s6  }
  0x23   :  { %s537_s18 = smov [#allocation8]   ;;  %s483_s23 = scalar_lea.hbm %s646_s3, 1024 }
  0x24   :  { %s44_s19 = sshll.u32 %s537_s18, 4  ;;  %p484_p2 = scmp.ne.s32.totalorder %s646_s3, %s483_s23  ;;  %s45_s19 = int_to_ptr.vmem [resolvable:$true] %s44_s19 }
  0x25   :  { %p487_p3 = scmp.lt.u32.totalorder %s483_s23, %s646_s3 }
  0x27   :  { %p489_p4 = pnand %p487_p3, %p484_p2 }
  0x29   :  { %492 = shalt.err (!%p489_p4)
}
  0x2a   :  { %s493_s28 = scalar_lea.vmem %s45_s19, 1024  ;;  %p498_p6 = scmp.lt.s32.totalorder %s45_s19, %s45_s19 }
  0x2b   :  { %p494_p5 = scmp.ne.s32.totalorder %s45_s19, %s493_s28  ;;  %p499_p7 = scmp.lt.s32.totalorder %s493_s28, %s493_s28 }
  0x2d   :  { %p500_p8 = por %p499_p7, %p498_p6 }
  0x2f   :  { %p501_p9 = pnand %p500_p8, %p494_p5 }
  0x31   :  { %504 = shalt.err (!%p501_p9)
}
  0x32   :  { %50 = dma.hbm_to_vmem [thread:$0]  %s646_s3, 1024, %s45_s19, [#allocation7], %s535_s30, %s535_s30, %s536_s6  }
  0x33   :  { %527 = dma.done.wait [#allocation4], 128  }
  0x34   :  { %528 = vsyncadd [#allocation4], 4294967168 }
  0x35   :  { %529 = dma.done.wait [#allocation7], 2048  }
  0x36   :  { %530 = vsyncadd [#allocation7], 4294965248  ;;  %v538_v0 = vmov 0.0   ;;  %vm539_vm0 = vmmov 0   ;;  %v422_v1 = vld [vmem:[#allocation6] sm:$0xff]   ;;  %v423_v2 = vld [vmem:[#allocation6 + $0x8] sm:$0xff]  }
  0x37   :  { %372 = vmatprep.subr.bf16.mxu0 %v538_v0  ;;  %388 = vmatprep.mubr.msk.bf16.mxu0 %vm539_vm0, %v538_v0  ;;  %v424_v3 = vld [vmem:[#allocation6 + $0x10] sm:$0xff]   ;;  %v431_v4 = vld [vmem:[#allocation8] sm:$0xff]   ;;  %v425_v5 = vld [vmem:[#allocation6 + $0x18] sm:$0xff]   ;;  %s540_s7 = smov [#allocation9]  }
  0x38   :  { %392 = vmatprep.subr.bf16.mxu1 %v538_v0  ;;  %408 = vmatprep.mubr.msk.bf16.mxu1 %vm539_vm0, %v538_v0  ;;  %v432_v6 = vld [vmem:[#allocation8 + $0x8] sm:$0xff]   ;;  %v426_v7 = vld [vmem:[#allocation6 + $0x20] sm:$0xff]   ;;  %v433_v8 = vld [vmem:[#allocation8 + $0x10] sm:$0xff]   ;;  %s322_s8 = sshll.u32 %s540_s7, 4  ;;  %s323_s8 = int_to_ptr.vmem [resolvable:$true] %s322_s8 }
  0x39   :  { %373 = vmatpush3.bf16.msra.mxu0 %v422_v1  ;;  %393 = vmatpush3.bf16.msra.mxu1 %v431_v4  ;;  %v427_v9 = vld [vmem:[#allocation6 + $0x28] sm:$0xff]   ;;  %v434_v10 = vld [vmem:[#allocation8 + $0x18] sm:$0xff]   ;;  %v428_v11 = vld [vmem:[#allocation6 + $0x30] sm:$0xff]   ;;  %p510_p11 = scmp.lt.s32.totalorder %s323_s8, %s323_s8 }
  0x3a   :  { %374 = vmatprep.subr.bf16.mxu0 %v538_v0  ;;  %394 = vmatprep.subr.bf16.mxu1 %v538_v0  ;;  %v435_v12 = vld [vmem:[#allocation8 + $0x20] sm:$0xff]   ;;  %v429_v13 = vld [vmem:[#allocation6 + $0x38] sm:$0xff]   ;;  %v436_v14 = vld [vmem:[#allocation8 + $0x28] sm:$0xff]  }
  0x3b   :  { %v430_v15 = vld [vmem:[#allocation3] sm:$0xff]   ;;  %v437_v16 = vld [vmem:[#allocation8 + $0x30] sm:$0xff]  }
  0x3c   :  { %v438_v17 = vld [vmem:[#allocation8 + $0x38] sm:$0xff]  }
  0x3d   :  { %375 = vmatpush3.bf16.msra.mxu0 %v423_v2  ;;  %395 = vmatpush3.bf16.msra.mxu1 %v432_v6  ;;  %v336_v18 = vld [vmem:[%s645_s2] ss:$0 sm:$0xff]  ;;  %s505_s2 = scalar_lea.vmem %s323_s8, 256 }
  0x3e   :  { %376 = vmatprep.subr.bf16.mxu0 %v538_v0  ;;  %396 = vmatprep.subr.bf16.mxu1 %v538_v0  ;;  %v335_v28 = vld [vmem:[%s647_s4] ss:$0 sm:$0xff]  ;;  %p506_p10 = scmp.ne.s32.totalorder %s323_s8, %s505_s2  ;;  %p511_p12 = scmp.lt.s32.totalorder %s505_s2, %s505_s2 }
  0x40   :  { %p512_p13 = por %p511_p12, %p510_p11 }
  0x41   :  { %377 = vmatpush3.bf16.msra.mxu0 %v424_v3  ;;  %397 = vmatpush3.bf16.msra.mxu1 %v433_v8 }
  0x42   :  { %378 = vmatprep.subr.bf16.mxu0 %v538_v0  ;;  %398 = vmatprep.subr.bf16.mxu1 %v538_v0  ;;  %p513_p0 = pnand %p512_p13, %p506_p10 }
  0x45   :  { %379 = vmatpush3.bf16.msra.mxu0 %v425_v5  ;;  %399 = vmatpush3.bf16.msra.mxu1 %v434_v10 }
  0x46   :  { %380 = vmatprep.subr.bf16.mxu0 %v538_v0  ;;  %400 = vmatprep.subr.bf16.mxu1 %v538_v0 }
  0x49   :  { %381 = vmatpush3.bf16.msra.mxu0 %v426_v7  ;;  %401 = vmatpush3.bf16.msra.mxu1 %v435_v12 }
  0x4a   :  { %382 = vmatprep.subr.bf16.mxu0 %v538_v0  ;;  %402 = vmatprep.subr.bf16.mxu1 %v538_v0 }
  0x4d   :  { %383 = vmatpush3.bf16.msra.mxu0 %v427_v9  ;;  %403 = vmatpush3.bf16.msra.mxu1 %v436_v14 }
  0x4e   :  { %384 = vmatprep.subr.bf16.mxu0 %v538_v0  ;;  %404 = vmatprep.subr.bf16.mxu1 %v538_v0 }
  0x51   :  { %385 = vmatpush3.bf16.msra.mxu0 %v428_v11  ;;  %405 = vmatpush3.bf16.msra.mxu1 %v437_v16 }
  0x52   :  { %386 = vmatprep.subr.bf16.mxu0 %v538_v0  ;;  %406 = vmatprep.subr.bf16.mxu1 %v538_v0 }
  0x55   :  { %387 = vmatpush3.bf16.msra.mxu0 %v429_v13  ;;  %407 = vmatpush3.bf16.msra.mxu1 %v438_v17 }
  0x58   :  { %389 = vmatmul.mubr.bf16.vlgmr.msra.gmra.mrb[0].mxu0 %v430_v15 }
 0x12b   :  { %v189_v19 = vpop.f32.mrb[0].mxu0 }
 0x12c   :  { %v190_v20 = vadd.f32 %v336_v18, %v189_v19  ;;  %v390_v21 = vpop.f32.mrb[1].mxu0 }
 0x12d   :  { %v192_v22 = vpop.f32.mrb[2].mxu0 }
 0x12e   :  { %v193_v23 = vadd.f32 %v336_v18, %v192_v22  ;;  %v391_v24 = vpop.f32.mrb[3].mxu0  ;;  %v196_v25 = vmax.f32 %v190_v20, 0.0 }
 0x130   :  { %v197_v26 = vmax.f32 %v193_v23, 0.0 }
 0x132   :  { %v200_v27 = vpack.c.bf16 %v197_v26, %v196_v25 }
 0x134   :  { %409 = vmatmul.mubr.bf16.vlgmr.msra.gmra.mrb[0].mxu1 %v200_v27 }
 0x207   :  { %v299_v29 = vpop.f32.mrb[0].mxu1 }
 0x208   :  { %v306_v30 = vadd.f32 %v335_v28, %v299_v29  ;;  %v410_v31 = vpop.f32.mrb[1].mxu1 }
 0x209   :  { %v302_v32 = vpop.f32.mrb[2].mxu1 }
 0x20a   :  { %315 = vst [vmem:[#allocation9] sm:$0xff] %v306_v30  ;;  %v307_v33 = vadd.f32 %v335_v28, %v302_v32  ;;  %v411_v34 = vpop.f32.mrb[3].mxu1 }
 0x20c   :  { %316 = vst [vmem:[#allocation9 + $0x8] sm:$0xff] %v307_v33 }
 0x20d   :  { %516 = shalt.err (!%p513_p0)
}
 0x20e   :  { %s517_s10 = scalar_lea.hbm %s648_s5, 256 }
 0x20f   :  { %p518_p1 = scmp.ne.s32.totalorder %s648_s5, %s517_s10  ;;  %p521_p2 = scmp.lt.u32.totalorder %s517_s10, %s648_s5 }
 0x211   :  { %p523_p3 = pnand %p521_p2, %p518_p1 }
 0x213   :  { %526 = shalt.err (!%p523_p3)
}
 0x214   :  { %s541_s15 = smov 128   ;;  %s542_s16 = smov 8  }
 0x215   :  { %328 = dma.vmem_to_hbm [thread:$0]  %s323_s8, 256, %s648_s5, [#allocation5], %s541_s15, %s541_s15, %s542_s16  }
 0x216   :  { %531 = dma.done.wait [#allocation5], 256  }
 0x217   :  { %532 = vsyncadd [#allocation5], 4294967040 }
 0x218   :  { %332 = vsyncpa [#allocation4], 1 }
 0x219   :  { %333 = vsyncpa [#allocation7], 1 }
 0x21a   :  { %334 = vsyncpa [#allocation5], 1 }

</bundles_post_ra>
